<compile_context>
chip_gen: v6e
topology: v6e:2x2x1
jax: 0.10.0
libtpu: 0.0.40
codegen_flags: <defaults>
</compile_context>

<pallas_src>
import jax
import jax.numpy as jnp
import numpy as np
from jax import lax
from jax.experimental import pallas as pl
from jax.experimental.pallas import tpu as pltpu


def _round_up(x, m):
    return (x + m - 1) // m * m


# ----------------------------------------------------------------------------
# Pallas kernel: one augmented matmul per (batch, M-tile) grid step.
# ----------------------------------------------------------------------------
def _encode_kernel(x_ref, w_ref, o_ref):
    #   x_ref: (1, tile_m, F_aug_p)   [x_flat | enc | 1 | 0-pad]          (bf16)
    #   w_ref: (1, F_aug_p, Dp)       [mask*w_x ; w_id ; bias ; 0-pad]    (bf16)
    #   o_ref: (1, tile_m, Dp)        all state-field outputs, lane-packed
    o_ref[0] = jnp.dot(x_ref[0], w_ref[0],
                       preferred_element_type=jnp.float32).astype(o_ref.dtype)


# ----------------------------------------------------------------------------
# Bidirectional GRU with input_size = 0 (id encoder) — plain JAX glue.
# ----------------------------------------------------------------------------
def bidirectional_gru_id(n_obj, gru_params, h0):
    """PyTorch nn.GRU(0, H, bidirectional=True) on zeros(1, n_obj, 0) with h0.
    Returns enc of shape (n_obj, 2*H) ( = (n_obj, dim_id) )."""
    def run_dir(p):
        def step(h, _):
            gh = h @ p["w_hh"].T + p["b_hh"]          # (3H,)
            i_r, i_z, i_n = jnp.split(p["b_ih"], 3)   # input contribution = bias only
            h_r, h_z, h_n = jnp.split(gh, 3)
            r = jax.nn.sigmoid(i_r + h_r)
            z = jax.nn.sigmoid(i_z + h_z)
            n = jnp.tanh(i_n + r * h_n)
            h_new = (1.0 - z) * n + z * h
            return h_new, h_new
        return step

    _, out_f = lax.scan(run_dir(gru_params[0]), h0[0, 0], xs=None, length=n_obj)
    _, out_b = lax.scan(run_dir(gru_params[1]), h0[1, 0], xs=None, length=n_obj)
    out_b = out_b[::-1]
    return jnp.concatenate([out_f, out_b], axis=-1)


# ----------------------------------------------------------------------------
# ClassEncoder: params + forward
# ----------------------------------------------------------------------------
def init_class_encoder_params(key, *, n_field_c, n_statefield_c, n_statefield,
                              dim_in, dim_local, dim_global, dim_id,
                              dtype=jnp.float32):
    assert dim_id % 2 == 0
    flat_dim = dim_in * n_field_c
    din_total = flat_dim + dim_id
    ks = jax.random.split(key, 10)
    scale = 0.1
    params = {
        "dim_id": dim_id,
        "w_local": scale * jax.random.normal(ks[0], (n_statefield_c, din_total, dim_local), dtype),
        "b_local": scale * jax.random.normal(ks[1], (n_statefield_c, dim_local), dtype),
        "w_global": scale * jax.random.normal(ks[2], (n_statefield, din_total, dim_global), dtype),
        "b_global": scale * jax.random.normal(ks[3], (n_statefield, dim_global), dtype),
    }
    if dim_id > 0:
        H = dim_id // 2
        gru = []
        for d in range(2):
            kk = jax.random.split(ks[4 + d], 3)
            gru.append({
                "w_hh": scale * jax.random.normal(kk[0], (3 * H, H), dtype),
                "b_ih": scale * jax.random.normal(kk[1], (3 * H,), dtype),
                "b_hh": scale * jax.random.normal(kk[2], (3 * H,), dtype),
            })
        params["gru"] = gru
        params["h0"] = jnp.zeros((2, 1, H), dtype)   # idencoder_h0 (init = zeros)
    return params


def class_encoder_forward(params, x, localmask, globalmask,
                          compute_dtype=jnp.bfloat16):
    """x: (B, n_obj, n_field, dim_in); localmask: (B, S_local, n_field);
    globalmask: (B, S_global, n_field).  Returns (out_local, out_global)."""
    B, n_obj, n_field, dim_in = x.shape
    F = n_field * dim_in
    out_dtype = x.dtype
    dim_id = params["dim_id"]
    f32 = jnp.float32

    w_local, b_local = params["w_local"], params["b_local"]
    w_global, b_global = params["w_global"], params["b_global"]
    S_l, _, d_l = w_local.shape
    S_g, _, d_g = w_global.shape
    D_cat = S_l * d_l + S_g * d_g

    # --- id encoding (sequential recurrence) -> plain JAX -------------------
    if dim_id > 0:
        enc = bidirectional_gru_id(n_obj, params["gru"], params["h0"]).astype(f32)
    else:
        enc = jnp.zeros((n_obj, 0), f32)

    # --- concatenated weights: columns are s-major, d-minor so the final
    #     reshape to (..., S, d) is copy-free ---------------------------------
    w_x_cat = jnp.concatenate(
        [jnp.transpose(w_local[:, :F, :], (1, 0, 2)).reshape(F, S_l * d_l),
         jnp.transpose(w_global[:, :F, :], (1, 0, 2)).reshape(F, S_g * d_g)],
        axis=-1).astype(f32)                                        # (F, D_cat)
    if dim_id > 0:
        w_id_cat = jnp.concatenate(
            [jnp.transpose(w_local[:, F:, :], (1, 0, 2)).reshape(dim_id, S_l * d_l),
             jnp.transpose(w_global[:, F:, :], (1, 0, 2)).reshape(dim_id, S_g * d_g)],
            axis=-1).astype(f32)                                    # (dim_id, D_cat)
    else:
        w_id_cat = jnp.zeros((0, D_cat), f32)
    b_cat = jnp.concatenate([b_local.reshape(-1),
                             b_global.reshape(-1)])[None, :].astype(f32)  # (1, D_cat)

    # --- fold the per-(b, state-field) attr mask into per-batch weights -----
    # masked_retain(x) @ w  ==  x @ (mask * w)   (mask is exactly 0/1)
    mask_all = jnp.concatenate([localmask.astype(f32),
                                globalmask.astype(f32)], axis=1)    # (B, S, n_field)
    col_s = np.concatenate([np.repeat(np.arange(S_l), d_l),
                            np.repeat(np.arange(S_g) + S_l, d_g)])  # (D_cat,) static
    mask_cols = mask_all[:, col_s, :]                               # (B, D_cat, n_field)
    mask_rows = jnp.repeat(jnp.transpose(mask_cols, (0, 2, 1)),
                           dim_in, axis=1)                          # (B, F, D_cat)
    w_x_b = mask_rows * w_x_cat[None]                               # (B, F, D_cat)

    F_aug = F + dim_id + 1
    F_aug_p = _round_up(F_aug, 8)          # K padded to sublane multiple
    Dp = _round_up(D_cat, 128)             # single lane-dense pad for ALL fields
    w_aug = jnp.concatenate(
        [w_x_b,
         jnp.broadcast_to(w_id_cat[None], (B, dim_id, D_cat)),
         jnp.broadcast_to(b_cat[None], (B, 1, D_cat))], axis=1)     # (B, F_aug, D_cat)
    w_aug = jnp.pad(w_aug, ((0, 0), (0, F_aug_p - F_aug),
                            (0, Dp - D_cat))).astype(compute_dtype)

    # --- augmented input rows: [x_flat | enc | 1 | 0-pad] --------------------
    n_obj_p = _round_up(n_obj, 8)
    tile_m = min(n_obj_p, 512)
    n_obj_p = _round_up(n_obj_p, tile_m)
    x_aug = jnp.concatenate(
        [x.reshape(B, n_obj, F).astype(f32),
         jnp.broadcast_to(enc[None], (B, n_obj, dim_id)),
         jnp.ones((B, n_obj, 1), f32)], axis=-1)                    # (B, n_obj, F_aug)
    x_aug = jnp.pad(x_aug, ((0, 0), (0, n_obj_p - n_obj),
                            (0, F_aug_p - F_aug))).astype(compute_dtype)

    n_m = n_obj_p // tile_m
    x_block = (1, tile_m, F_aug_p)
    w_block = (1, F_aug_p, Dp)
    o_block = (1, tile_m, Dp)

    itemsize_c = np.dtype(compute_dtype).itemsize
    itemsize_o = np.dtype(out_dtype).itemsize
    blk_bytes = ((tile_m * F_aug_p + F_aug_p * Dp) * itemsize_c
                 + tile_m * Dp * itemsize_o)
    vmem_limit = int(min(48 * 1024 * 1024, max(16 * 1024 * 1024, 4 * blk_bytes)))

    cost = pl.CostEstimate(
        flops=2 * B * n_obj_p * F_aug_p * Dp,
        transcendentals=0,
        bytes_accessed=int((B * n_obj_p * F_aug_p + B * F_aug_p * Dp) * itemsize_c
                           + B * n_obj_p * Dp * itemsize_o))

    out = pl.pallas_call(
        _encode_kernel,
        out_shape=jax.ShapeDtypeStruct((B, n_obj_p, Dp), out_dtype),
        grid_spec=pltpu.PrefetchScalarGridSpec(
            num_scalar_prefetch=0,
            grid=(B, n_m),
            in_specs=[
                pl.BlockSpec(x_block, lambda b, m: (b, m, 0)),   # input rows
                pl.BlockSpec(w_block, lambda b, m: (b, 0, 0)),   # per-batch weight
            ],
            out_specs=pl.BlockSpec(o_block, lambda b, m: (b, m, 0)),
        ),
        compiler_params=pltpu.CompilerParams(
            dimension_semantics=("parallel", "parallel"),
            vmem_limit_bytes=vmem_limit),
        cost_estimate=cost,
    )(x_aug, w_aug)

    # Strip padding; per-field views are copy-free reshapes (no transpose).
    out = out[:, :n_obj, :D_cat]
    out_local = out[:, :, :S_l * d_l].reshape(B, n_obj, S_l, d_l)
    out_global = out[:, :, S_l * d_l:].reshape(B, n_obj, S_g, d_g)
    return out_local, out_global


# ----------------------------------------------------------------------------
# Pure-JAX reference (for correctness check)
# ----------------------------------------------------------------------------
def reference_forward(params, x, localmask, globalmask):
    B, n_obj, n_field, dim_in = x.shape
    enc = None
    if params["dim_id"] > 0:
        enc = bidirectional_gru_id(n_obj, params["gru"], params["h0"]).astype(x.dtype)

    def encode(mask, w, b):
        mask = mask.astype(x.dtype)
        S = mask.shape[1]
        xm = jnp.where(mask[:, None, :, :, None] > 0, x[:, :, None, :, :], 0.0)
        xf = xm.reshape(B, n_obj, S, n_field * dim_in)
        if enc is not None:
            e = jnp.broadcast_to(enc[None, :, None, :],
                                 (B, n_obj, S, enc.shape[-1]))
            xf = jnp.concatenate([xf, e], axis=-1)
        return jnp.einsum("bosd,sde->bose", xf, w) + b[None, None, :, :]

    return (encode(localmask, params["w_local"], params["b_local"]),
            encode(globalmask, params["w_global"], params["b_global"]))


if __name__ == "__main__":
    # Small synthetic configuration consistent with the module's forward.
    B, n_obj, n_field_c, dim_in = 2, 5, 3, 4
    n_statefield_c, n_statefield = 2, 3      # local / global state-field counts
    dim_local, dim_global, dim_id = 32, 16, 4

    key = jax.random.PRNGKey(0)
    k_p, k_x, k_lm, k_gm = jax.random.split(key, 4)

    params = init_class_encoder_params(
        k_p, n_field_c=n_field_c, n_statefield_c=n_statefield_c,
        n_statefield=n_statefield, dim_in=dim_in, dim_local=dim_local,
        dim_global=dim_global, dim_id=dim_id)

    x = jax.random.normal(k_x, (B, n_obj, n_field_c, dim_in), jnp.float32)
    localmask = jax.random.bernoulli(k_lm, 0.6, (B, n_statefield_c, n_field_c))
    globalmask = jax.random.bernoulli(k_gm, 0.6, (B, n_statefield, n_field_c))

    out_local, out_global = class_encoder_forward(params, x, localmask, globalmask)
    jax.block_until_ready((out_local, out_global))

    ref_local, ref_global = reference_forward(params, x, localmask, globalmask)
    assert out_local.shape == (B, n_obj, n_statefield_c, dim_local)
    assert out_global.shape == (B, n_obj, n_statefield, dim_global)
    # bf16 matmul operands (f32 accumulation) -> slightly loosened tolerance.
    np.testing.assert_allclose(np.asarray(out_local), np.asarray(ref_local),
                               rtol=2e-2, atol=2e-2)
    np.testing.assert_allclose(np.asarray(out_global), np.asarray(ref_global),
                               rtol=2e-2, atol=2e-2)
    print("KERNEL_OK")
</pallas_src>

<mosaic_0001>
module attributes {stable_mosaic.version = 11 : i64} {
  func.func @_encode_kernel(%arg0: i32, %arg1: i32, %arg2: memref<1x8x24xbf16, #tpu.memory_space<vmem>>, %arg3: memref<1x24x128xbf16, #tpu.memory_space<vmem>>, %arg4: memref<1x8x128xf32, #tpu.memory_space<vmem>>) attributes {dimension_semantics = [#tpu.dimension_semantics<parallel>, #tpu.dimension_semantics<parallel>], iteration_bounds = array<i64: 2, 1>, scalar_prefetch = 0 : i64, scratch_operands = 0 : i64, tpu.core_type = #tpu.core_type<tc>, window_params = [{transform_indices = @transform_0, window_bounds = array<i64: 1, 8, 24>}, {transform_indices = @transform_1, window_bounds = array<i64: 1, 24, 128>}, {transform_indices = @transform_2, window_bounds = array<i64: 1, 8, 128>}]} {
    %c0 = arith.constant 0 : index
    %c0_0 = arith.constant 0 : index
    %c0_1 = arith.constant 0 : index
    %0 = vector.load %arg2[%c0, %c0_0, %c0_1] : memref<1x8x24xbf16, #tpu.memory_space<vmem>>, vector<1x8x24xbf16>
    %1 = vector.shape_cast %0 : vector<1x8x24xbf16> to vector<8x24xbf16>
    %c0_2 = arith.constant 0 : index
    %c0_3 = arith.constant 0 : index
    %c0_4 = arith.constant 0 : index
    %2 = vector.load %arg3[%c0_2, %c0_3, %c0_4] : memref<1x24x128xbf16, #tpu.memory_space<vmem>>, vector<1x24x128xbf16>
    %3 = vector.shape_cast %2 : vector<1x24x128xbf16> to vector<24x128xbf16>
    %cst = arith.constant dense<0.000000e+00> : vector<8x128xf32>
    %4 = tpu.matmul %1, %3, %cst {dimension_numbers = #tpu.dot_dimension_numbers<[1], [0], [0], [1], [0, 0, 1, 1], [], []>} : vector<8x24xbf16>, vector<24x128xbf16>, vector<8x128xf32> -> vector<8x128xf32>
    %c0_5 = arith.constant 0 : index
    %c0_6 = arith.constant 0 : index
    %c0_7 = arith.constant 0 : index
    %5 = vector.load %arg4[%c0_5, %c0_6, %c0_7] : memref<1x8x128xf32, #tpu.memory_space<vmem>>, vector<1x8x128xf32>
    %6 = vector.shape_cast %5 : vector<1x8x128xf32> to vector<8x128xf32>
    %7 = vector.shape_cast %4 : vector<8x128xf32> to vector<1x8x128xf32>
    tpu.vector_store %arg4[%c0_5, %c0_6, %c0_7], %7 {strides = array<i32>} : memref<1x8x128xf32, #tpu.memory_space<vmem>>, vector<1x8x128xf32>,
    return
  }
  func.func @transform_0(%arg0: i32, %arg1: i32) -> (i32, i32, i32) {
    %c0_i32 = arith.constant 0 : i32
    %c0_i32_0 = arith.constant 0 : i32
    return %arg0, %arg1, %c0_i32 : i32, i32, i32
  }
  func.func @transform_1(%arg0: i32, %arg1: i32) -> (i32, i32, i32) {
    %c0_i32 = arith.constant 0 : i32
    %c0_i32_0 = arith.constant 0 : i32
    %c0_i32_1 = arith.constant 0 : i32
    return %arg0, %c0_i32, %c0_i32_0 : i32, i32, i32
  }
  func.func @transform_2(%arg0: i32, %arg1: i32) -> (i32, i32, i32) {
    %c0_i32 = arith.constant 0 : i32
    %c0_i32_0 = arith.constant 0 : i32
    return %arg0, %arg1, %c0_i32 : i32, i32, i32
  }
}

</mosaic_0001>

<bundles_post_ra>
// kernel: tpu_custom_call.1
= control target key start
LH: loop header
LB: loop body
LE: loop exit
PB: predicated region body
PF: predicated region fallthrough
CT: control target
= control target key end

     0   :  { %7 = vsyncpa [#allocation3], 0  ;;  %s842_s0 = inlined_call_operand.hbm [shape: bf16[2,8,24], index: 0, kind: input, shape index: {}]   ;;  %s843_s1 = inlined_call_operand.hbm [shape: bf16[2,24,128], index: 1, kind: input, shape index: {}]   ;;  %s844_s2 = inlined_call_operand.hbm [shape: f32[2,8,128], index: 2, kind: output, shape index: {}]  }
   0x1   :  { %9 = vsyncpa [#allocation3 + $0x1], 0 }
   0x2   :  { %10 = vsyncpa [#allocation6], 0 }
   0x3   :  { %12 = vsyncpa [#allocation6 + $0x1], 0 }
   0x4   :  { %13 = vsyncpa [#allocation4], 0 }
   0x5   :  { %15 = vsyncpa [#allocation4 + $0x1], 0  ;;  %s665_s9 = smov 0   ;;  %s667_s10 = smov 0  }
   0x6   :  { %s669_s11 = smov 0   ;;  %s671_s12 = smov 0  }
   0x7   :  { %s673_s13 = smov 0   ;;  %s675_s14 = smov 0  }
   0x8 LB: > { %s397_s15 = sadd.s32 4294967295, %s641_s14   ;;  %s398_s16 = sadd.s32 4294967294, %s641_s14   ;;  %s641_s14 = sphi %s675_s14, %s21_s14   ;;  %s637_s13 = sphi %s673_s13, %s856_s13   ;;  %s633_s12 = sphi %s671_s12, %s855_s12   ;;  %s629_s11 = sphi %s669_s11, %s854_s11   ;;  %s625_s10 = sphi %s667_s10, %s853_s10   ;;  %s621_s9 = sphi %s665_s9, %s852_s9  }
   0x9   : > { %s33_s17 = sadd.s32 1, %s637_s13  ;;  %s42_s18 = sadd.s32 1, %s629_s11 }
   0xa   : > { %p35_p0 = scmp.ge.s32.totalorder %s33_s17, 2  ;;  %p49_p1 = scmp.ne.s32.totalorder %s629_s11, %s625_s10 }
   0xb   : > { %p50_p2 = scmp.eq.s32.totalorder %s641_s14, 0  ;;  %p55_p3 = scmp.ne.s32.totalorder %s625_s10, %s621_s9 }
   0xc   : > { %s858_s17 = smov (%p35_p0, %s33_s17), 0  ;;  %p56_p5 = scmp.eq.s32.totalorder %s397_s15, 0 }
   0xd   : > { %p706_p4 = por %p50_p2, %p49_p1  ;;  %s37_s20 = ssub.s32 %s637_s13, %s858_s17 }
   0xe   : > { %p107_p6 = scmp.eq.s32.totalorder %s397_s15, 1  ;;  %p40_p7 = scmp.eq.s32.totalorder %s37_s20, 0 }
   0xf   : > { %p712_p8 = por %p56_p5, %p55_p3  ;;  %p113_p10 = scmp.eq.s32.totalorder %s398_s16, 1 }
  0x10   : > { %p716_p9 = por %p107_p6, %p49_p1  ;;  %p445_p13 = scmp.lt.s32.totalorder %s641_s14, 2 }
  0x11   : > { %s721_s23 = scalar_select %p40_p7, %s629_s11, %s42_s18  }
  0x12   : > { %p723_p11 = por %p113_p10, %p55_p3  ;;  %s730_s25 = sand.u32 1, %s629_s11  }
  0x13   : > { %s401_s26 = sshll.u32 %s730_s25, 2  ;;  %s402_s27 = sshll.u32 %s637_s13, 6 }
  0x14   : > { %s143_s30 = scalar_lea.hbm %s842_s0, %s402_s27  ;;  %s137_s3 = scalar_lea.vmem [#allocation2], %s401_s26 }
  0x15   : > { %s145_s4 = sshll.u32 %s137_s3, 4  ;;  %p739_p0 = pnand %p445_p13, %p706_p4  ;;  %s146_s4 = int_to_ptr.vmem [resolvable:$true] %s145_s4 }
  0x16   : > { %p404_p1 = scmp.ge.s32.totalorder %s641_s14, 1  ;;  %p171_p2 = scmp.lt.s32.totalorder %s641_s14, 3 }
  0x17   : > { %s134_s6 = scalar_lea.sflag [#allocation3], %s730_s25  ;;  %p503_p3 = pneg %p739_p0 }
  0x18   : > { %s514_s7 = scalar_lea.vmem %s146_s4, 64  ;;  %s643_s8 = smov [#allocation2]  }
  0x19   : > { %p515_p5 = scmp.ne.s32.totalorder %s146_s4, %s514_s7  ;;  %s519_s15 = sshll.u32 %s643_s8, 4  ;;  %s520_s15 = int_to_ptr.vmem [resolvable:$false] %s519_s15 }
  0x1a   : > { %s521_s16 = scalar_lea.vmem %s520_s15, 128  ;;  %p522_p4 = scmp.lt.s32.totalorder %s146_s4, %s520_s15 }
  0x1b   : > { %p517_p6 = pnand %p515_p5, %p503_p3  ;;  %p523_p10 = scmp.lt.s32.totalorder %s521_s16, %s514_s7 }
  0x1d   : > { %p518_p7 = pneg %p517_p6  ;;  %p524_p13 = por %p523_p10, %p522_p4 }
  0x1f   : > { %p525_p12 = pnand %p524_p13, %p518_p7 }
  0x21   : > { %528 = shalt.err (!%p525_p12)
}
  0x22   : > { %437 = dma.hbm_to_vmem [thread:$0]  (!%p739_p0), %s143_s30, 64, %s146_s4, %s134_s6  }
  0x23   : > { %p757_p5 = pnand %p404_p1, %p171_p2  ;;  %s425_s19 = smul.u32 12, %s730_s25 }
  0x24   : > { %s426_s20 = smul.u32 192, %s637_s13  ;;  %s153_s7 = scalar_lea.sflag [#allocation6], %s730_s25 }
  0x25   : > { %s156_s29 = scalar_lea.vmem [#allocation5], %s425_s19  ;;  %s644_s30 = smov [#allocation5]  }
  0x26   : > { %s162_s28 = scalar_lea.hbm %s843_s1, %s426_s20  ;;  %s163_s3 = sshll.u32 %s156_s29, 4  ;;  %s164_s3 = int_to_ptr.vmem [resolvable:$true] %s163_s3 }
  0x27   : > { %s542_s8 = scalar_lea.vmem %s164_s3, 192  ;;  %s547_s4 = sshll.u32 %s644_s30, 4  ;;  %s548_s4 = int_to_ptr.vmem [resolvable:$false] %s547_s4 }
  0x28   : > { %p543_p12 = scmp.ne.s32.totalorder %s164_s3, %s542_s8  ;;  %s549_s6 = scalar_lea.vmem %s548_s4, 384 }
  0x29   : > { %p550_p1 = scmp.lt.s32.totalorder %s164_s3, %s548_s4  ;;  %p551_p2 = scmp.lt.s32.totalorder %s549_s6, %s542_s8 }
  0x2a   : > { %p545_p6 = pnand %p543_p12, %p503_p3 }
  0x2b   : > { %p552_p4 = por %p551_p2, %p550_p1 }
  0x2c   : > { %p546_p7 = pneg %p545_p6 }
  0x2e   : > { %p553_p10 = pnand %p552_p4, %p546_p7 }
  0x30   : > { %556 = shalt.err (!%p553_p10)
}
  0x31   : > { %s645_s15 = smov 64   ;;  %s646_s16 = smov 4  }
  0x32   : > { %440 = dma.hbm_to_vmem [thread:$0]  (!%p739_p0), %s162_s28, 192, %s164_s3, %s153_s7, %s645_s15, %s645_s15, %s646_s16  }
  0x33   : > { %175 = sbr.rel (%p757_p5) target bundleno = 279 (0x117), region = 28  ;;  %s775_s25 = sand.u32 (!%p757_p5), 1, %s625_s10  }
  0x34   : > { %s405_s19 = sshll.u32 (!%p757_p5), %s775_s25, 2  ;;  %s178_s20 = scalar_lea.sflag (!%p757_p5), [#allocation3], %s775_s25 }
  0x35   : > { %s181_s26 = scalar_lea.vmem (!%p757_p5), [#allocation2], %s405_s19 }
  0x38   : > { %608 = dma.done.wait (%p712_p8), %s178_s20, 64  }
  0x39   : > { %610 = vsyncadd (%p712_p8), %s178_s20, 4294967232  ;;  %s427_s5 = smul.u32 12, %s775_s25  ;;  %s187_s18 = scalar_lea.sflag [#allocation6], %s775_s25 }
  0x3b   : > { %s190_s27 = scalar_lea.vmem [#allocation5], %s427_s5 }
  0x3c   : > { %612 = dma.done.wait (%p712_p8), %s187_s18, 192  }
  0x3d   : > { %614 = vsyncadd (%p712_p8), %s187_s18, 4294967104  ;;  %v647_v0 = vmov 0.0   ;;  %vm648_vm0 = vmmov 0   ;;  %vm234_vm1 = vcmask 1043456   ;;  %v499_v1 = vld [vmem:[%s190_s27 + $0x8] ss:$0 sps:$4 sm:$0xff]  }
  0x3e   : > { %417 = vmatprep.subr.bf16.mxu0 %v647_v0  ;;  %421 = vmatprep.mubr.msk.bf16.mxu0 %vm648_vm0, %v647_v0  ;;  %v236_v2 = vsel %vm234_vm1, %v499_v1, 0  ;;  %v500_v3 = vld [vmem:[%s190_s27] sm:$0xff]   ;;  %v217_v4 = vld [vmem:[%s181_s26] sm:$0xf]  ;;  %vm230_vm2 = vcmask 195584   ;;  %s406_s21 = sshll.u32 %s775_s25, 3 }
  0x3f   : > { %418 = vmatpush3.bf16.msra.mxu0 %v236_v2  ;;  %s215_s28 = scalar_lea.vmem [#allocation7], %s406_s21  ;;  %s411_s3 = sshll.u32 %s633_s12, 7 }
  0x40   : > { %419 = vmatprep.subr.bf16.mxu0 %v647_v0  ;;  %s294_s29 = sshll.u32 %s215_s28, 4  ;;  %s796_s30 = scalar_lea.hbm %s844_s2, %s411_s3  ;;  %s791_s29 = int_to_ptr.vmem [resolvable:$true] %s294_s29 }
  0x41   : > { %s280_s4 = scalar_lea.sflag [#allocation4], %s775_s25  ;;  %s557_s6 = scalar_lea.vmem %s791_s29, 128 }
  0x42   : > { %p558_p8 = scmp.ne.s32.totalorder %s791_s29, %s557_s6  ;;  %s649_s12 = smov [#allocation7]  }
  0x43   : > { %420 = vmatpush3.bf16.msra.mxu0 %v500_v3  ;;  %s561_s15 = sshll.u32 %s649_s12, 4  ;;  %s562_s15 = int_to_ptr.vmem [resolvable:$false] %s561_s15 }
  0x44   : > { %p559_p0 = pnand %p558_p8, %p716_p9  ;;  %s563_s16 = scalar_lea.vmem %s562_s15, 256 }
  0x45   : > { %p564_p13 = scmp.lt.s32.totalorder %s791_s29, %s562_s15  ;;  %p565_p5 = scmp.lt.s32.totalorder %s563_s16, %s557_s6 }
  0x46   : > { %422 = vmatmul.mubr.msk.bf16.vlgmr.msra.gmra.mxu0 %vm230_vm2, %v217_v4  ;;  %p560_p3 = pneg %p559_p0 }
  0x47   : > { %p566_p12 = por %p565_p5, %p564_p13 }
  0x49   : > { %p567_p6 = pnand %p566_p12, %p560_p3 }
 0x106   : > { %v272_v5 = vpop.f32.mrf.mxu0 }
 0x107   : > { %278 = vst [vmem:[%s215_s28] sm:$0xff] %v272_v5 }
 0x108   : > { %v423_v6 = vpop.f32.mrf.mxu0 }
 0x109   : > { %570 = shalt.err (!%p567_p6)
}
 0x10a   : > { %s571_s19 = scalar_lea.hbm %s796_s30, 128  ;;  %s575_s26 = scalar_lea.hbm %s844_s2, 256 }
 0x10b   : > { %p572_p7 = scmp.ne.s32.totalorder %s796_s30, %s571_s19  ;;  %p576_p4 = scmp.lt.s32.totalorder %s796_s30, %s844_s2 }
 0x10c   : > { %p577_p10 = scmp.lt.s32.totalorder %s575_s26, %s571_s19 }
 0x10d   : > { %p573_p1 = pnand %p572_p7, %p716_p9 }
 0x10e   : > { %p578_p8 = por %p577_p10, %p576_p4 }
 0x10f   : > { %p574_p2 = pneg %p573_p1 }
 0x111   : > { %p579_p0 = pnand %p578_p8, %p574_p2 }
 0x113   : > { %582 = shalt.err (!%p579_p0)
}
 0x114   : > { %432 = dma.vmem_to_hbm [thread:$0]  (%p716_p9), %s791_s29, 128, %s796_s30, %s280_s4   ;;  %v275_v7 = vpop.f32.mrf.mxu0 }
 0x116   : > { %v424_v8 = vpop.f32.mrf.mxu0 }
 0x117 PF: > { %s306_s27 = sand.u32 1, %s621_s9   ;;  %p851_p3 = scmp.ge.s32.totalorder %s641_s14, 2 }
 0x118   : > { %s307_s21 = scalar_lea.sflag [#allocation4], %s306_s27 }
 0x119   : > { %p442_p13 = pnand %p851_p3, %p723_p11 }
 0x11b   : > { %p443_p5 = pneg %p442_p13 }
 0x11d   : > { %616 = dma.done.wait (%p443_p5), %s307_s21, 128  }
 0x11e   : > { %618 = vsyncadd (%p443_p5), %s307_s21, 4294967168  ;;  %s21_s14 = sadd.s32 1, %s641_s14   ;;  %s852_s9 = smov %s625_s10 }
 0x11f   : > { %p18_p12 = scmp.ge.s32.totalorder %s21_s14, 4   ;;  %s853_s10 = smov %s629_s11 }
 0x120   : > { %s854_s11 = smov %s721_s23  ;;  %s855_s12 = smov %s637_s13 }
 0x121   : > { %s856_s13 = smov %s858_s17  ;;  %20 = sbr.rel (!%p18_p12) target bundleno = 8 (0x8), region = 86 }
 0x126   :  { %312 = vsyncpa [#allocation3], 1 }
 0x127   :  { %314 = vsyncpa [#allocation3 + $0x1], 1 }
 0x128   :  { %315 = vsyncpa [#allocation6], 1 }
 0x129   :  { %317 = vsyncpa [#allocation6 + $0x1], 1 }
 0x12a   :  { %318 = vsyncpa [#allocation4], 1 }
 0x12b   :  { %320 = vsyncpa [#allocation4 + $0x1], 1 }

</bundles_post_ra>
